<compile_context>
chip_gen: v6e
topology: v6e:2x2x1
jax: 0.10.0
libtpu: 0.0.40
codegen_flags: <defaults>
</compile_context>

<pallas_src>
import functools

import jax
import jax.numpy as jnp
from jax.experimental import pallas as pl
from jax.experimental.pallas import tpu as pltpu

_LANES = 128


def _smooth_l1(pred, target):
    # nn.SmoothL1Loss(reduction='none') with default beta = 1.0
    d = pred - target
    ad = jnp.abs(d)
    return jnp.where(ad < 1.0, 0.5 * d * d, ad - 0.5)


def _l1_loss_kernel(scales_ref, pred_ref, tgt_ref, out_ref, *, n_transl, inv_batch):
    i = pl.program_id(0)

    @pl.when(i == 0)
    def _init():
        out_ref[...] = jnp.zeros_like(out_ref)

    sl1 = _smooth_l1(pred_ref[...], tgt_ref[...])        # (D, TILE_B) f32
    # Padded lanes contribute exactly 0 (pred == target == 0 -> smooth_l1 == 0).
    loss_t = jnp.sum(sl1[:n_transl, :], keepdims=True)   # (1, 1) translation branch
    loss_r = jnp.sum(sl1[n_transl:, :], keepdims=True)   # (1, 1) rotation branch
    out_ref[...] += scales_ref[0] * loss_t + scales_ref[1] * loss_r

    @pl.when(i == pl.num_programs(0) - 1)
    def _finalize():
        out_ref[...] = out_ref[...] * inv_batch          # mean over true batch


def l1_loss(target_transl, target_rot, transl_err, rot_err,
            rescale_trans=1.0, rescale_rot=1.0, *, max_tile_lanes=8192):
    """Pallas equivalent of L1Loss.forward; returns a scalar f32."""
    B, d_t = target_transl.shape
    d_r = target_rot.shape[1]
    D = d_t + d_r                                        # 3 + 4 = 7

    # Lane-dense layout: features (7) on sublanes, batch on lanes.
    pred = jnp.concatenate(
        [transl_err.astype(jnp.float32).T, rot_err.astype(jnp.float32).T], axis=0)
    tgt = jnp.concatenate(
        [target_transl.astype(jnp.float32).T, target_rot.astype(jnp.float32).T],
        axis=0)

    b_rounded = pl.cdiv(B, _LANES) * _LANES
    tile_b = min(max_tile_lanes, b_rounded)              # (7, 8192) f32 ~ 224 KiB/buf
    b_pad = pl.cdiv(b_rounded, tile_b) * tile_b
    if b_pad != B:                                       # zero-pad -> zero contribution
        pred = jnp.pad(pred, ((0, 0), (0, b_pad - B)))
        tgt = jnp.pad(tgt, ((0, 0), (0, b_pad - B)))

    scales = jnp.stack([jnp.asarray(rescale_trans, jnp.float32),
                        jnp.asarray(rescale_rot, jnp.float32)])

    grid = (b_pad // tile_b,)
    kernel = functools.partial(_l1_loss_kernel, n_transl=d_t, inv_batch=1.0 / B)

    out = pl.pallas_call(
        kernel,
        out_shape=jax.ShapeDtypeStruct((1, 1), jnp.float32),
        grid_spec=pltpu.PrefetchScalarGridSpec(
            num_scalar_prefetch=0,
            grid=grid,
            in_specs=[
                pl.BlockSpec(memory_space=pltpu.MemorySpace.SMEM),  # scales (2,)
                pl.BlockSpec((D, tile_b), lambda i: (0, i)),        # pred   (D, B_pad)
                pl.BlockSpec((D, tile_b), lambda i: (0, i)),        # target (D, B_pad)
            ],
            out_specs=pl.BlockSpec((1, 1), lambda i: (0, 0)),       # resident accumulator
        ),
        compiler_params=pltpu.CompilerParams(
            dimension_semantics=("arbitrary",)),
    )(scales, pred, tgt)
    return out[0, 0]


def _reference(target_transl, target_rot, transl_err, rot_err,
               rescale_trans, rescale_rot):
    lt = _smooth_l1(transl_err.astype(jnp.float32),
                    target_transl.astype(jnp.float32)).sum(1).mean()
    lr = _smooth_l1(rot_err.astype(jnp.float32),
                    target_rot.astype(jnp.float32)).sum(1).mean()
    return rescale_trans * lt + rescale_rot * lr


if __name__ == "__main__":
    key = jax.random.PRNGKey(0)
    k1, k2, k3, k4 = jax.random.split(key, 4)

    B = 8                       # batch
    D_T, D_R = 3, 4             # translation (xyz), rotation (quaternion)
    rescale_trans, rescale_rot = 2.0, 0.5   # deterministic module "params"

    target_transl = jax.random.normal(k1, (B, D_T), dtype=jnp.float32)
    target_rot = jax.random.normal(k2, (B, D_R), dtype=jnp.float32)
    transl_err = jax.random.normal(k3, (B, D_T), dtype=jnp.float32)
    rot_err = jax.random.normal(k4, (B, D_R), dtype=jnp.float32)

    out = l1_loss(target_transl, target_rot, transl_err, rot_err,
                  rescale_trans, rescale_rot)
    out = jax.block_until_ready(out)

    ref = _reference(target_transl, target_rot, transl_err, rot_err,
                     rescale_trans, rescale_rot)
    assert jnp.allclose(out, ref, rtol=1e-5, atol=1e-5), (out, ref)

    print("KERNEL_OK")
</pallas_src>

<mosaic_0001>
module attributes {stable_mosaic.version = 11 : i64} {
  func.func @_l1_loss_kernel(%arg0: i32, %arg1: memref<2xf32, #tpu.memory_space<smem>>, %arg2: memref<7x128xf32, #tpu.memory_space<vmem>>, %arg3: memref<7x128xf32, #tpu.memory_space<vmem>>, %arg4: memref<1x1xf32, #tpu.memory_space<vmem>>) attributes {dimension_semantics = [#tpu.dimension_semantics<arbitrary>], iteration_bounds = array<i64: 1>, scalar_prefetch = 0 : i64, scratch_operands = 0 : i64, tpu.core_type = #tpu.core_type<tc>, window_params = [{transform_indices = @transform_0, window_bounds = array<i64: 2>}, {transform_indices = @transform_1, window_bounds = array<i64: 7, 128>}, {transform_indices = @transform_2, window_bounds = array<i64: 7, 128>}, {pipeline_mode = #tpu.pipeline_mode<synchronous>, transform_indices = @transform_3, window_bounds = array<i64: 1, 1>}]} {
    %c0_i32 = arith.constant 0 : i32
    %0 = arith.cmpi eq, %arg0, %c0_i32 : i32
    %1 = arith.extui %0 : i1 to i32
    %c0_i32_0 = arith.constant 0 : i32
    %2 = arith.cmpi ne, %1, %c0_i32_0 : i32
    scf.if %2 {
      %cst_15 = arith.constant 0.000000e+00 : f32
      %40 = vector.broadcast %cst_15 : f32 to vector<1x1xf32>
      %c0_16 = arith.constant 0 : index
      %c0_17 = arith.constant 0 : index
      %41 = vector.load %arg4[%c0_16, %c0_17] : memref<1x1xf32, #tpu.memory_space<vmem>>, vector<1x1xf32>
      tpu.vector_store %arg4[%c0_16, %c0_17], %40 {strides = array<i32>} : memref<1x1xf32, #tpu.memory_space<vmem>>, vector<1x1xf32>,
    } else {
    }
    %c0 = arith.constant 0 : index
    %c0_1 = arith.constant 0 : index
    %3 = vector.load %arg2[%c0, %c0_1] : memref<7x128xf32, #tpu.memory_space<vmem>>, vector<7x128xf32>
    %c0_2 = arith.constant 0 : index
    %c0_3 = arith.constant 0 : index
    %4 = vector.load %arg3[%c0_2, %c0_3] : memref<7x128xf32, #tpu.memory_space<vmem>>, vector<7x128xf32>
    %5 = arith.subf %3, %4 : vector<7x128xf32>
    %6 = math.absf %5 : vector<7x128xf32>
    %cst = arith.constant 1.000000e+00 : f32
    %7 = vector.broadcast %cst : f32 to vector<7x128xf32>
    %8 = arith.cmpf olt, %6, %7 : vector<7x128xf32>
    %cst_4 = arith.constant 5.000000e-01 : f32
    %9 = vector.broadcast %cst_4 : f32 to vector<7x128xf32>
    %10 = arith.mulf %9, %5 : vector<7x128xf32>
    %11 = arith.mulf %10, %5 : vector<7x128xf32>
    %cst_5 = arith.constant 5.000000e-01 : f32
    %12 = vector.broadcast %cst_5 : f32 to vector<7x128xf32>
    %13 = arith.subf %6, %12 : vector<7x128xf32>
    %14 = arith.select %8, %11, %13 : vector<7x128xi1>, vector<7x128xf32>
    %15 = vector.extract_strided_slice %14 {offsets = [0, 0], sizes = [3, 128], strides = [1, 1]} : vector<7x128xf32> to vector<3x128xf32>
    %16 = vector.shape_cast %15 : vector<3x128xf32> to vector<1x3x128xf32>
    %cst_6 = arith.constant dense<0.000000e+00> : vector<1xf32>
    %17 = vector.multi_reduction <add>, %16, %cst_6 [1, 2] : vector<1x3x128xf32> to vector<1xf32>
    %18 = vector.shape_cast %17 : vector<1xf32> to vector<1x1x1xf32>
    %19 = vector.extract %18[0, 0, 0] : f32 from vector<1x1x1xf32>
    %20 = vector.broadcast %19 : f32 to vector<1x1xf32>
    %21 = vector.extract_strided_slice %14 {offsets = [3, 0], sizes = [4, 128], strides = [1, 1]} : vector<7x128xf32> to vector<4x128xf32>
    %22 = vector.shape_cast %21 : vector<4x128xf32> to vector<1x4x128xf32>
    %cst_7 = arith.constant dense<0.000000e+00> : vector<1xf32>
    %23 = vector.multi_reduction <add>, %22, %cst_7 [1, 2] : vector<1x4x128xf32> to vector<1xf32>
    %24 = vector.shape_cast %23 : vector<1xf32> to vector<1x1x1xf32>
    %25 = vector.extract %24[0, 0, 0] : f32 from vector<1x1x1xf32>
    %26 = vector.broadcast %25 : f32 to vector<1x1xf32>
    %c0_8 = arith.constant 0 : index
    %c0_9 = arith.constant 0 : index
    %27 = vector.load %arg4[%c0_8, %c0_9] : memref<1x1xf32, #tpu.memory_space<vmem>>, vector<1x1xf32>
    %c0_10 = arith.constant 0 : index
    %28 = memref.load %arg1[%c0_10] : memref<2xf32, #tpu.memory_space<smem>>
    %29 = vector.broadcast %28 : f32 to vector<1x1xf32>
    %30 = arith.mulf %29, %20 : vector<1x1xf32>
    %c1 = arith.constant 1 : index
    %31 = memref.load %arg1[%c1] : memref<2xf32, #tpu.memory_space<smem>>
    %32 = vector.broadcast %31 : f32 to vector<1x1xf32>
    %33 = arith.mulf %32, %26 : vector<1x1xf32>
    %34 = arith.addf %30, %33 : vector<1x1xf32>
    %35 = arith.addf %27, %34 : vector<1x1xf32>
    %c0_11 = arith.constant 0 : index
    %c0_12 = arith.constant 0 : index
    %36 = vector.load %arg4[%c0_11, %c0_12] : memref<1x1xf32, #tpu.memory_space<vmem>>, vector<1x1xf32>
    tpu.vector_store %arg4[%c0_11, %c0_12], %35 {strides = array<i32>} : memref<1x1xf32, #tpu.memory_space<vmem>>, vector<1x1xf32>,
    %c0_i32_13 = arith.constant 0 : i32
    %37 = arith.cmpi eq, %arg0, %c0_i32_13 : i32
    %38 = arith.extui %37 : i1 to i32
    %c0_i32_14 = arith.constant 0 : i32
    %39 = arith.cmpi ne, %38, %c0_i32_14 : i32
    scf.if %39 {
      %c0_15 = arith.constant 0 : index
      %c0_16 = arith.constant 0 : index
      %40 = vector.load %arg4[%c0_15, %c0_16] : memref<1x1xf32, #tpu.memory_space<vmem>>, vector<1x1xf32>
      %cst_17 = arith.constant 1.250000e-01 : f32
      %41 = vector.broadcast %cst_17 : f32 to vector<1x1xf32>
      %42 = arith.mulf %40, %41 : vector<1x1xf32>
      %c0_18 = arith.constant 0 : index
      %c0_19 = arith.constant 0 : index
      %43 = vector.load %arg4[%c0_18, %c0_19] : memref<1x1xf32, #tpu.memory_space<vmem>>, vector<1x1xf32>
      tpu.vector_store %arg4[%c0_18, %c0_19], %42 {strides = array<i32>} : memref<1x1xf32, #tpu.memory_space<vmem>>, vector<1x1xf32>,
    } else {
    }
    return
  }
  func.func @transform_0(%arg0: i32) -> i32 {
    %c0_i32 = arith.constant 0 : i32
    %c0_i32_0 = arith.constant 0 : i32
    return %c0_i32 : i32
  }
  func.func @transform_1(%arg0: i32) -> (i32, i32) {
    %c0_i32 = arith.constant 0 : i32
    %c0_i32_0 = arith.constant 0 : i32
    return %c0_i32, %arg0 : i32, i32
  }
  func.func @transform_2(%arg0: i32) -> (i32, i32) {
    %c0_i32 = arith.constant 0 : i32
    %c0_i32_0 = arith.constant 0 : i32
    return %c0_i32, %arg0 : i32, i32
  }
  func.func @transform_3(%arg0: i32) -> (i32, i32) {
    %c0_i32 = arith.constant 0 : i32
    %c0_i32_0 = arith.constant 0 : i32
    %c0_i32_1 = arith.constant 0 : i32
    return %c0_i32, %c0_i32_0 : i32, i32
  }
}

</mosaic_0001>

<bundles_post_ra>
// kernel: tpu_custom_call.1
= control target key start
LH: loop header
LB: loop body
LE: loop exit
PB: predicated region body
PF: predicated region fallthrough
CT: control target
= control target key end

     0   :  { %8 = vsyncpa [#allocation5], 0  ;;  %s253_s0 = inlined_call_operand.hbm [shape: f32[2], index: 0, kind: input, shape index: {}]   ;;  %s254_s1 = inlined_call_operand.hbm [shape: f32[7,128], index: 1, kind: input, shape index: {}]   ;;  %s255_s2 = inlined_call_operand.hbm [shape: f32[7,128], index: 2, kind: input, shape index: {}]   ;;  %s256_s3 = inlined_call_operand.hbm [shape: f32[1,1], index: 3, kind: output, shape index: {}]  }
   0x1   :  { %9 = vsyncpa [#allocation3], 0 }
   0x2   :  { %10 = vsyncpa [#allocation8], 0 }
   0x3   :  { %11 = vsyncpa [#allocation4], 0  ;;  %s213_s12 = smov [#allocation2]   ;;  %s214_s15 = smov [#allocation6]  }
   0x4   :  { %19 = dma.hbm_to_smem %s253_s0, 16, %s213_s12, [#allocation5]  }
   0x5   :  { %s26_s16 = sshll.u32 %s214_s15, 4  ;;  %s215_s17 = smov [#allocation7]   ;;  %s27_s16 = int_to_ptr.vmem [resolvable:$true] %s26_s16 }
   0x6   :  { %s36_s18 = sshll.u32 %s215_s17, 4  ;;  %s153_s19 = scalar_lea.vmem %s27_s16, 128  ;;  %s37_s18 = int_to_ptr.vmem [resolvable:$true] %s36_s18 }
   0x7   :  { %p154_p0 = scmp.ne.s32.totalorder %s27_s16, %s153_s19  ;;  %p158_p1 = scmp.lt.s32.totalorder %s27_s16, %s27_s16 }
   0x8   :  { %p159_p2 = scmp.lt.s32.totalorder %s153_s19, %s153_s19 }
   0xa   :  { %p160_p3 = por %p159_p2, %p158_p1 }
   0xc   :  { %p161_p4 = pnand %p160_p3, %p154_p0 }
   0xe   :  { %164 = shalt.err (!%p161_p4)
}
   0xf   :  { %29 = dma.hbm_to_vmem [thread:$0]  %s254_s1, 128, %s27_s16, [#allocation3]  }
  0x10   :  { %s173_s22 = scalar_lea.vmem %s37_s18, 128  ;;  %p178_p6 = scmp.lt.s32.totalorder %s37_s18, %s37_s18 }
  0x11   :  { %p174_p5 = scmp.ne.s32.totalorder %s37_s18, %s173_s22  ;;  %p179_p7 = scmp.lt.s32.totalorder %s173_s22, %s173_s22 }
  0x13   :  { %p180_p8 = por %p179_p7, %p178_p6 }
  0x15   :  { %p181_p9 = pnand %p180_p8, %p174_p5 }
  0x17   :  { %184 = shalt.err (!%p181_p9)
}
  0x18   :  { %39 = dma.hbm_to_vmem [thread:$0]  %s255_s2, 128, %s37_s18, [#allocation8]  }
  0x19   :  { %205 = dma.done.wait [#allocation5], 16  }
  0x1a   :  { %206 = vsyncadd [#allocation5], 4294967280 }
  0x1b   :  { %207 = dma.done.wait [#allocation3], 128  }
  0x1c   :  { %208 = vsyncadd [#allocation3], 4294967168 }
  0x1d   :  { %209 = dma.done.wait [#allocation8], 128  }
  0x1e   :  { %210 = vsyncadd [#allocation8], 4294967168 }
  0x1f   :  { %49 = sfence }
  0x20   :  { %v56_v0 = vld [vmem:[#allocation6] sm:$0x7f]  ;;  %v57_v1 = vld [vmem:[#allocation7] sm:$0x7f]  ;;  %vm65_vm1 = vcmask 1042432   ;;  %vm80_vm2 = vcmask 1043456  }
  0x21   :  { %v58_v2 = vsub.f32 %v56_v0, %v57_v1  ;;  %vm54_vm3 = vcmask 0   ;;  %v216_v11 = vmov 0.0   ;;  %s93_s1 = sld [smem:[#allocation2]]  ;;  %s217_s26 = smov [#allocation9]  }
  0x22   :  { %55 = vst.msk [vmem:[#allocation9] sm:$0x1] %vm54_vm3, %v216_v11  ;;  %s127_s2 = sld [smem:[#allocation2 + $0x1]]  ;;  %s115_s27 = sshll.u32 %s217_s26, 4  ;;  %s116_s27 = int_to_ptr.vmem [resolvable:$true] %s115_s27 }
  0x23   :  { %v59_v3 = vand.u32 2147483647, %v58_v2  ;;  %v61_v4 = vmul.f32 0.5, %v58_v2  ;;  %s185_s28 = scalar_lea.vmem %s116_s27, 16  ;;  %s189_s29 = scalar_lea.vmem %s116_s27, 32 }
  0x24   :  { %p186_p10 = scmp.ne.s32.totalorder %s116_s27, %s185_s28  ;;  %p190_p11 = scmp.lt.s32.totalorder %s116_s27, %s116_s27 }
  0x25   :  { %vm60_vm0 = vcmp.lt.f32.partialorder %v59_v3, 1.0  ;;  %v62_v5 = vmul.f32 %v61_v4, %v58_v2  ;;  %v126_v6 = vadd.f32 -0.5, %v59_v3  ;;  %p191_p12 = scmp.lt.s32.totalorder %s189_s29, %s185_s28 }
  0x27   :  { %v64_v7 = vsel %vm60_vm0, %v62_v5, %v126_v6  ;;  %v94_v27 = vstv %s93_s1  ;;  %p192_p13 = por %p191_p12, %p190_p11 }
  0x28   :  { %v66_v8 = vsel %vm65_vm1, %v64_v7, 0.0  ;;  %v78_v9 = vrot.slane %v64_v7, 3  ;;  %v97_v28 = vstv %s127_s2 }
  0x29   :  { %67 = vadd.xlane.f32.xlu0 %v66_v8  ;;  %v92_v32 = vld [vmem:[#allocation9] sm:$0x1]  ;;  %p193_p0 = pnand %p192_p13, %p186_p10 }
  0x2a   :  { %v81_v10 = vsel %vm80_vm2, %v78_v9, 0.0 }
  0x2d   :  { %82 = vadd.xlane.f32.xlu0 %v81_v10 }
  0xb2   :  { %v68_v12 = vpop.xlane.xlu0 %67 }
  0xb3   :  { %v69_v13 = vrot.slane %v68_v12, 4 }
  0xb5   :  { %v70_v14 = vadd.f32 %v69_v13, %v68_v12 }
  0xb6   :  { %v83_v15 = vpop.xlane.xlu0 %82 }
  0xb7   :  { %v71_v16 = vrot.slane %v70_v14, 2  ;;  %v84_v17 = vrot.slane %v83_v15, 4 }
  0xb9   :  { %v85_v18 = vadd.f32 %v84_v17, %v83_v15  ;;  %v72_v19 = vadd.f32 %v71_v16, %v70_v14 }
  0xbb   :  { %v86_v20 = vrot.slane %v85_v18, 2  ;;  %v73_v21 = vrot.slane %v72_v19, 1 }
  0xbd   :  { %v87_v22 = vadd.f32 %v86_v20, %v85_v18  ;;  %v74_v23 = vadd.f32 %v73_v21, %v72_v19 }
  0xbf   :  { %128 = vpush %v74_v23  ;;  %v88_v24 = vrot.slane %v87_v22, 1 }
  0xc1   :  { %v89_v25 = vadd.f32 %v88_v24, %v87_v22 }
  0xc3   :  { %130 = vpush %v89_v25 }
  0xf0   :  { %s129_s24 = spop %128 }
  0xf1   :  { %v76_v26 = vstv %s129_s24 }
  0xf2   :  { %v95_v30 = vmul.f32 %v94_v27, %v76_v26 }
  0xf4   :  { %s131_s25 = spop %130 }
  0xf5   :  { %v91_v29 = vstv %s131_s25 }
  0xf6   :  { %v98_v31 = vmul.f32 %v97_v28, %v91_v29 }
  0xf8   :  { %v99_v33 = vadd.f32 %v98_v31, %v95_v30 }
  0xfa   :  { %v100_v34 = vadd.f32 %v99_v33, %v92_v32 }
  0xfc   :  { %102 = vst.msk [vmem:[#allocation9] sm:$0x1] %vm54_vm3, %v100_v34 }
 0x103   :  { %v106_v35 = vld [vmem:[#allocation9] sm:$0x1] }
 0x104   :  { %v107_v36 = vmul.f32 0.125, %v106_v35 }
 0x106   :  { %108 = vst.msk [vmem:[#allocation9] sm:$0x1] %vm54_vm3, %v107_v36 }
 0x107   :  { %196 = shalt.err (!%p193_p0)
}
 0x108   :  { %118 = dma.vmem_to_hbm [thread:$0]  %s116_s27, 16, %s256_s3, [#allocation4]  }
 0x109   :  { %211 = dma.done.wait [#allocation4], 16  }
 0x10a   :  { %212 = vsyncadd [#allocation4], 4294967280 }
 0x10b   :  { %122 = vsyncpa [#allocation3], 1 }
 0x10c   :  { %123 = vsyncpa [#allocation8], 1 }
 0x10d   :  { %124 = vsyncpa [#allocation4], 1 }
 0x10e   :  { %125 = vsyncpa [#allocation5], 1 }

</bundles_post_ra>
